<compile_context>
chip_gen: v7x
topology: tpu7x:2x2x1
jax: 0.10.0
libtpu: 0.0.40
codegen_flags: <defaults>
</compile_context>

<pallas_src>
import functools

import numpy as np
import jax
import jax.numpy as jnp
from jax import lax
from jax.experimental import pallas as pl
from jax.experimental.pallas import tpu as pltpu

EPS = 1e-5


# ---------------------------------------------------------------------------
# Kernels.  Each works on one image: channels on sublanes, H*W pixels on lanes.
# ---------------------------------------------------------------------------
def _conv1_kernel(x_ref, w1_ref, f1_ref, ssum_ref, ssq_ref):
    """1x1 conv (C -> Cr) + per-image per-channel (sum, sum_sq) for BN1."""
    x = x_ref[0].astype(jnp.bfloat16)                                  # (C, HW)
    f1 = jnp.dot(w1_ref[...], x, preferred_element_type=jnp.float32)  # (Cr, HW)
    f1_ref[0] = f1
    ssum_ref[0] = jnp.sum(f1, axis=1, keepdims=True)
    ssq_ref[0] = jnp.sum(f1 * f1, axis=1, keepdims=True)


def _conv2_kernel(f1_ref, s1_ref, t1_ref, w2_ref, f2_ref, ssum_ref, ssq_ref,
                  *, H, W):
    """BN1 (scale/shift) + ReLU, then 3x3 conv (padding=1) + stats for BN2.

    The 9 taps are static lane-axis slices of a zero-extended copy of the
    activation (a value, not a scratch buffer), masked with hoisted boundary
    masks, and concatenated once along the contraction dim so the whole conv
    is a single MXU matmul with K = 9*Cr.
    """
    HW = H * W
    f1 = jnp.maximum(f1_ref[0] * s1_ref[...] + t1_ref[...], 0.0)      # (Cr, HW)
    Cr = f1.shape[0]

    # Lane-aligned zero extension so every tap is one full-width static slice.
    PADL = ((W + 1 + 127) // 128) * 128
    zpad = jnp.zeros((Cr, PADL), jnp.float32)
    f1p = jnp.concatenate([zpad, f1, zpad], axis=1)           # (Cr, HW + 2*PADL)

    # Hoisted boundary masks (shared across taps): 4 compares total.
    pix = lax.broadcasted_iota(jnp.int32, (1, HW), 1)
    ww = pix % W
    h_ok = (pix >= W, None, pix < (H - 1) * W)                # tap row dy = 0,1,2
    w_ok = (ww >= 1, None, ww <= W - 2)                       # tap col dx = 0,1,2

    taps = []
    for dy in range(3):
        for dx in range(3):
            off = (dy - 1) * W + (dx - 1)
            win = f1p[:, PADL + off: PADL + off + HW]         # (Cr, HW)
            hm, wm = h_ok[dy], w_ok[dx]
            m = hm if wm is None else (wm if hm is None else hm & wm)
            if m is not None:                                 # center tap: no mask
                win = jnp.where(m, win, 0.0)
            taps.append(win)
    # All 9 taps on the contraction dim -> one MXU matmul with K = 9*Cr.
    win9 = jnp.concatenate(taps, axis=0).astype(jnp.bfloat16)        # (9*Cr, HW)
    acc = jnp.dot(w2_ref[...], win9, preferred_element_type=jnp.float32)

    f2_ref[0] = acc
    ssum_ref[0] = jnp.sum(acc, axis=1, keepdims=True)
    ssq_ref[0] = jnp.sum(acc * acc, axis=1, keepdims=True)


def _conv3_kernel(f2_ref, s2_ref, t2_ref, w3_ref, f3_ref, ssum_ref, ssq_ref):
    """BN2 (scale/shift) + ReLU, 1x1 conv (Cr -> C) + stats for BN3."""
    f2 = jnp.maximum(f2_ref[0] * s2_ref[...] + t2_ref[...], 0.0)
    f3 = jnp.dot(w3_ref[...], f2.astype(jnp.bfloat16),
                 preferred_element_type=jnp.float32)                  # (C, HW)
    f3_ref[0] = f3
    ssum_ref[0] = jnp.sum(f3, axis=1, keepdims=True)
    ssq_ref[0] = jnp.sum(f3 * f3, axis=1, keepdims=True)


def _residual_kernel(f3_ref, x_ref, s3_ref, t3_ref, out_ref):
    """BN3 (scale/shift) + residual add + ReLU."""
    out_ref[0] = jnp.maximum(
        f3_ref[0] * s3_ref[...] + t3_ref[...] + x_ref[0], 0.0)


# ---------------------------------------------------------------------------
# Wrapper helpers
# ---------------------------------------------------------------------------
def _img_spec(ch, hw):
    return pl.BlockSpec((1, ch, hw), lambda n: (n, 0, 0))


def _stat_spec(ch):
    return pl.BlockSpec((1, ch, 1), lambda n: (n, 0, 0))


def _const_spec(shape):
    zeros = (0,) * len(shape)
    return pl.BlockSpec(shape, lambda n: zeros)


def _compiler_params(working_set_bytes):
    # Floor at 4 MiB, stay well below v7x's 64 MiB physical VMEM.
    limit = int(min(max(2 * working_set_bytes, 4 * 2**20), 56 * 2**20))
    return pltpu.CompilerParams(dimension_semantics=("parallel",),
                                vmem_limit_bytes=limit)


def _cost(flops, bytes_accessed):
    return pl.CostEstimate(flops=int(flops), transcendentals=0,
                           bytes_accessed=int(bytes_accessed))


def _bn_scale_shift(sums, sqs, gamma, beta, count):
    """Training-mode BatchNorm (biased batch variance) folded into y = z*s + t."""
    mean = jnp.sum(sums, axis=0) / count                      # (Ch, 1)
    var = jnp.maximum(jnp.sum(sqs, axis=0) / count - mean * mean, 0.0)
    s = gamma.reshape(-1, 1) * lax.rsqrt(var + EPS)
    t = beta.reshape(-1, 1) - mean * s
    return s, t


# ---------------------------------------------------------------------------
# Forward pass
# ---------------------------------------------------------------------------
@jax.jit
def resblock_forward(x_nchw, params):
    """ResBlock forward.  `params` are PyTorch-native tensors:
       conv1.weight (Cr,C,1,1), bn1 gamma/beta (Cr,),
       conv2.weight (Cr,Cr,3,3), bn2 gamma/beta (Cr,),
       conv3.weight (C,Cr,1,1),  bn3 gamma/beta (C,)."""
    w1, g1, b1, w2, g2, b2, w3, g3, b3 = params
    N, C, H, W = x_nchw.shape
    assert C % 2 == 0
    Cr = C // 2
    HW = H * W
    count = N * HW
    f32 = jnp.float32

    x = x_nchw.reshape(N, C, HW).astype(f32)     # NCHW -> (N, C, H*W), no transpose

    # PyTorch OIHW -> kernel layouts, pre-cast once to bf16 (native MXU input).
    w1_k = w1.reshape(Cr, C).astype(jnp.bfloat16)                    # (Cr, C)
    w3_k = w3.reshape(C, Cr).astype(jnp.bfloat16)                    # (C, Cr)
    # (Cr_out, 9*Cr_in), tap order (dy, dx) row-major to match the kernel.
    w2_k = jnp.concatenate(
        [w2[:, :, dy, dx] for dy in range(3) for dx in range(3)],
        axis=1).astype(jnp.bfloat16)

    # --- stage 1: 1x1 conv + BN1 partial stats -------------------------------
    f1, f1_sum, f1_sq = pl.pallas_call(
        _conv1_kernel,
        grid=(N,),
        in_specs=[_img_spec(C, HW), _const_spec((Cr, C))],
        out_specs=(_img_spec(Cr, HW), _stat_spec(Cr), _stat_spec(Cr)),
        out_shape=(jax.ShapeDtypeStruct((N, Cr, HW), f32),
                   jax.ShapeDtypeStruct((N, Cr, 1), f32),
                   jax.ShapeDtypeStruct((N, Cr, 1), f32)),
        compiler_params=_compiler_params(4 * HW * (2 * C + 3 * Cr)),
        cost_estimate=_cost(2 * N * HW * C * Cr + 3 * N * HW * Cr,
                            4 * N * HW * (C + Cr)),
    )(x, w1_k)
    s1, t1 = _bn_scale_shift(f1_sum, f1_sq, g1, b1, count)

    # --- stage 2: BN1+ReLU, 3x3 conv + BN2 partial stats ---------------------
    f2, f2_sum, f2_sq = pl.pallas_call(
        functools.partial(_conv2_kernel, H=H, W=W),
        grid=(N,),
        in_specs=[_img_spec(Cr, HW), _const_spec((Cr, 1)), _const_spec((Cr, 1)),
                  _const_spec((Cr, 9 * Cr))],
        out_specs=(_img_spec(Cr, HW), _stat_spec(Cr), _stat_spec(Cr)),
        out_shape=(jax.ShapeDtypeStruct((N, Cr, HW), f32),
                   jax.ShapeDtypeStruct((N, Cr, 1), f32),
                   jax.ShapeDtypeStruct((N, Cr, 1), f32)),
        compiler_params=_compiler_params(4 * HW * Cr * 20),
        cost_estimate=_cost(2 * N * HW * 9 * Cr * Cr + 24 * N * HW * Cr,
                            4 * N * HW * 2 * Cr),
    )(f1, s1, t1, w2_k)
    s2, t2 = _bn_scale_shift(f2_sum, f2_sq, g2, b2, count)

    # --- stage 3: BN2+ReLU, 1x1 conv + BN3 partial stats ---------------------
    f3, f3_sum, f3_sq = pl.pallas_call(
        _conv3_kernel,
        grid=(N,),
        in_specs=[_img_spec(Cr, HW), _const_spec((Cr, 1)), _const_spec((Cr, 1)),
                  _const_spec((C, Cr))],
        out_specs=(_img_spec(C, HW), _stat_spec(C), _stat_spec(C)),
        out_shape=(jax.ShapeDtypeStruct((N, C, HW), f32),
                   jax.ShapeDtypeStruct((N, C, 1), f32),
                   jax.ShapeDtypeStruct((N, C, 1), f32)),
        compiler_params=_compiler_params(4 * HW * (3 * Cr + 2 * C)),
        cost_estimate=_cost(2 * N * HW * Cr * C + 3 * N * HW * C,
                            4 * N * HW * (Cr + C)),
    )(f2, s2, t2, w3_k)
    s3, t3 = _bn_scale_shift(f3_sum, f3_sq, g3, b3, count)

    # --- stage 4: BN3 + residual add + ReLU ----------------------------------
    out = pl.pallas_call(
        _residual_kernel,
        grid=(N,),
        in_specs=[_img_spec(C, HW), _img_spec(C, HW),
                  _const_spec((C, 1)), _const_spec((C, 1))],
        out_specs=_img_spec(C, HW),
        out_shape=jax.ShapeDtypeStruct((N, C, HW), f32),
        compiler_params=_compiler_params(4 * HW * 6 * C),
        cost_estimate=_cost(3 * N * HW * C, 4 * N * HW * 3 * C),
    )(f3, x, s3, t3)

    return out.reshape(N, C, H, W)


# ---------------------------------------------------------------------------
# Pure-JAX reference (PyTorch-native weights / layout)
# ---------------------------------------------------------------------------
def resblock_reference(x_nchw, params, matmul_dtype=jnp.float32):
    """Reference.  `matmul_dtype=bfloat16` mirrors the kernel's MXU inputs
    (accumulation and BatchNorm stay float32)."""
    w1, g1, b1, w2, g2, b2, w3, g3, b3 = params
    x = x_nchw.astype(jnp.float32)

    def conv(z, w, pad):
        return lax.conv_general_dilated(
            z.astype(matmul_dtype), w.astype(matmul_dtype),
            window_strides=(1, 1), padding=((pad, pad), (pad, pad)),
            dimension_numbers=('NCHW', 'OIHW', 'NCHW'),
            preferred_element_type=jnp.float32)

    def bn(z, g, b):
        mu = jnp.mean(z, axis=(0, 2, 3), keepdims=True)
        var = jnp.maximum(
            jnp.mean(z * z, axis=(0, 2, 3), keepdims=True) - mu * mu, 0.0)
        s = g.reshape(1, -1, 1, 1) * lax.rsqrt(var + EPS)
        return z * s + (b.reshape(1, -1, 1, 1) - mu * s)

    f = jax.nn.relu(bn(conv(x, w1, 0), g1, b1))
    f = jax.nn.relu(bn(conv(f, w2, 1), g2, b2))
    f = bn(conv(f, w3, 0), g3, b3)
    return jax.nn.relu(f + x)


if __name__ == "__main__":
    # Small shapes consistent with ResBlock(channels=16); x is NCHW.
    N, C, H, W = 2, 16, 16, 16
    Cr = C // 2

    key = jax.random.PRNGKey(0)
    ks = jax.random.split(key, 10)
    params = (
        jax.random.normal(ks[0], (Cr, C, 1, 1), jnp.float32) * 0.3,    # conv1 OIHW
        jax.random.uniform(ks[1], (Cr,), jnp.float32, 0.5, 1.5),       # bn1 gamma
        jax.random.normal(ks[2], (Cr,), jnp.float32) * 0.1,            # bn1 beta
        jax.random.normal(ks[3], (Cr, Cr, 3, 3), jnp.float32) * 0.25,  # conv2 OIHW
        jax.random.uniform(ks[4], (Cr,), jnp.float32, 0.5, 1.5),       # bn2 gamma
        jax.random.normal(ks[5], (Cr,), jnp.float32) * 0.1,            # bn2 beta
        jax.random.normal(ks[6], (C, Cr, 1, 1), jnp.float32) * 0.6,    # conv3 OIHW
        jax.random.uniform(ks[7], (C,), jnp.float32, 0.5, 1.5),        # bn3 gamma
        jax.random.normal(ks[8], (C,), jnp.float32) * 0.1,             # bn3 beta
    )
    x = jax.random.normal(ks[9], (N, C, H, W), jnp.float32)

    out = jax.block_until_ready(resblock_forward(x, params))
    assert out.shape == x.shape and out.dtype == jnp.float32

    # Primary check: reference that also feeds bf16 into the convs (isolates
    # kernel-structure errors from the intended bf16 MXU rounding).
    ref_bf16 = jax.block_until_ready(
        resblock_reference(x, params, matmul_dtype=jnp.bfloat16))
    np.testing.assert_allclose(np.asarray(out), np.asarray(ref_bf16),
                               rtol=5e-3, atol=5e-3)

    # Secondary check: exact f32 module semantics (difference = bf16 rounding).
    ref_f32 = jax.block_until_ready(resblock_reference(x, params))
    np.testing.assert_allclose(np.asarray(out), np.asarray(ref_f32),
                               rtol=5e-2, atol=5e-2)

    # TODO(synk): BatchNorm running_mean/running_var buffer updates (training-
    # time side effect) are not reproduced; they do not affect the forward pass.
    print("KERNEL_OK")
</pallas_src>

<mosaic_0001>
module attributes {stable_mosaic.version = 11 : i64} {
  func.func @_conv1_kernel(%arg0: i32, %arg1: memref<1x16x256xf32, #tpu.memory_space<vmem>>, %arg2: memref<8x16xbf16, #tpu.memory_space<vmem>>, %arg3: memref<1x8x256xf32, #tpu.memory_space<vmem>>, %arg4: memref<1x8x1xf32, #tpu.memory_space<vmem>>, %arg5: memref<1x8x1xf32, #tpu.memory_space<vmem>>) attributes {dimension_semantics = [#tpu.dimension_semantics<parallel>], iteration_bounds = array<i64: 2>, scalar_prefetch = 0 : i64, scratch_operands = 0 : i64, tpu.core_type = #tpu.core_type<tc>, window_params = [{transform_indices = @transform_0, window_bounds = array<i64: 1, 16, 256>}, {pipeline_mode = #tpu.pipeline_mode<synchronous>, transform_indices = @transform_1, window_bounds = array<i64: 8, 16>}, {transform_indices = @transform_2, window_bounds = array<i64: 1, 8, 256>}, {transform_indices = @transform_3, window_bounds = array<i64: 1, 8, 1>}, {transform_indices = @transform_4, window_bounds = array<i64: 1, 8, 1>}]} {
    %c0 = arith.constant 0 : index
    %c0_0 = arith.constant 0 : index
    %c0_1 = arith.constant 0 : index
    %0 = vector.load %arg1[%c0, %c0_0, %c0_1] : memref<1x16x256xf32, #tpu.memory_space<vmem>>, vector<1x16x256xf32>
    %1 = vector.shape_cast %0 : vector<1x16x256xf32> to vector<16x256xf32>
    %2 = arith.truncf %1 : vector<16x256xf32> to vector<16x256xbf16>
    %c0_2 = arith.constant 0 : index
    %c0_3 = arith.constant 0 : index
    %3 = vector.load %arg2[%c0_2, %c0_3] : memref<8x16xbf16, #tpu.memory_space<vmem>>, vector<8x16xbf16>
    %cst = arith.constant dense<0.000000e+00> : vector<8x256xf32>
    %4 = tpu.matmul %3, %2, %cst {dimension_numbers = #tpu.dot_dimension_numbers<[1], [0], [0], [1], [0, 0, 1, 1], [], []>} : vector<8x16xbf16>, vector<16x256xbf16>, vector<8x256xf32> -> vector<8x256xf32>
    %c0_4 = arith.constant 0 : index
    %c0_5 = arith.constant 0 : index
    %c0_6 = arith.constant 0 : index
    %5 = vector.load %arg3[%c0_4, %c0_5, %c0_6] : memref<1x8x256xf32, #tpu.memory_space<vmem>>, vector<1x8x256xf32>
    %6 = vector.shape_cast %5 : vector<1x8x256xf32> to vector<8x256xf32>
    %7 = vector.shape_cast %4 : vector<8x256xf32> to vector<1x8x256xf32>
    tpu.vector_store %arg3[%c0_4, %c0_5, %c0_6], %7 {strides = array<i32>} : memref<1x8x256xf32, #tpu.memory_space<vmem>>, vector<1x8x256xf32>,
    %cst_7 = arith.constant dense<0.000000e+00> : vector<8xf32>
    %8 = vector.multi_reduction <add>, %4, %cst_7 [1] : vector<8x256xf32> to vector<8xf32>
    %9 = vector.shape_cast %8 : vector<8xf32> to vector<8x1xf32>
    %c0_8 = arith.constant 0 : index
    %c0_9 = arith.constant 0 : index
    %c0_10 = arith.constant 0 : index
    %10 = vector.load %arg4[%c0_8, %c0_9, %c0_10] : memref<1x8x1xf32, #tpu.memory_space<vmem>>, vector<1x8x1xf32>
    %11 = vector.shape_cast %10 : vector<1x8x1xf32> to vector<8x1xf32>
    %12 = vector.shape_cast %9 : vector<8x1xf32> to vector<1x8x1xf32>
    tpu.vector_store %arg4[%c0_8, %c0_9, %c0_10], %12 {strides = array<i32>} : memref<1x8x1xf32, #tpu.memory_space<vmem>>, vector<1x8x1xf32>,
    %13 = arith.mulf %4, %4 : vector<8x256xf32>
    %cst_11 = arith.constant dense<0.000000e+00> : vector<8xf32>
    %14 = vector.multi_reduction <add>, %13, %cst_11 [1] : vector<8x256xf32> to vector<8xf32>
    %15 = vector.shape_cast %14 : vector<8xf32> to vector<8x1xf32>
    %c0_12 = arith.constant 0 : index
    %c0_13 = arith.constant 0 : index
    %c0_14 = arith.constant 0 : index
    %16 = vector.load %arg5[%c0_12, %c0_13, %c0_14] : memref<1x8x1xf32, #tpu.memory_space<vmem>>, vector<1x8x1xf32>
    %17 = vector.shape_cast %16 : vector<1x8x1xf32> to vector<8x1xf32>
    %18 = vector.shape_cast %15 : vector<8x1xf32> to vector<1x8x1xf32>
    tpu.vector_store %arg5[%c0_12, %c0_13, %c0_14], %18 {strides = array<i32>} : memref<1x8x1xf32, #tpu.memory_space<vmem>>, vector<1x8x1xf32>,
    return
  }
  func.func @transform_0(%arg0: i32) -> (i32, i32, i32) {
    %c0_i32 = arith.constant 0 : i32
    %c0_i32_0 = arith.constant 0 : i32
    %c0_i32_1 = arith.constant 0 : i32
    return %arg0, %c0_i32, %c0_i32_0 : i32, i32, i32
  }
  func.func @transform_1(%arg0: i32) -> (i32, i32) {
    %c0_i32 = arith.constant 0 : i32
    %c0_i32_0 = arith.constant 0 : i32
    %c0_i32_1 = arith.constant 0 : i32
    return %c0_i32, %c0_i32_0 : i32, i32
  }
  func.func @transform_2(%arg0: i32) -> (i32, i32, i32) {
    %c0_i32 = arith.constant 0 : i32
    %c0_i32_0 = arith.constant 0 : i32
    %c0_i32_1 = arith.constant 0 : i32
    return %arg0, %c0_i32, %c0_i32_0 : i32, i32, i32
  }
  func.func @transform_3(%arg0: i32) -> (i32, i32, i32) {
    %c0_i32 = arith.constant 0 : i32
    %c0_i32_0 = arith.constant 0 : i32
    %c0_i32_1 = arith.constant 0 : i32
    return %arg0, %c0_i32, %c0_i32_0 : i32, i32, i32
  }
  func.func @transform_4(%arg0: i32) -> (i32, i32, i32) {
    %c0_i32 = arith.constant 0 : i32
    %c0_i32_0 = arith.constant 0 : i32
    %c0_i32_1 = arith.constant 0 : i32
    return %arg0, %c0_i32, %c0_i32_0 : i32, i32, i32
  }
}

module attributes {stable_mosaic.version = 11 : i64} {
  func.func @_conv3_kernel(%arg0: i32, %arg1: memref<1x8x256xf32, #tpu.memory_space<vmem>>, %arg2: memref<8x1xf32, #tpu.memory_space<vmem>>, %arg3: memref<8x1xf32, #tpu.memory_space<vmem>>, %arg4: memref<16x8xbf16, #tpu.memory_space<vmem>>, %arg5: memref<1x16x256xf32, #tpu.memory_space<vmem>>, %arg6: memref<1x16x1xf32, #tpu.memory_space<vmem>>, %arg7: memref<1x16x1xf32, #tpu.memory_space<vmem>>) attributes {dimension_semantics = [#tpu.dimension_semantics<parallel>], iteration_bounds = array<i64: 2>, scalar_prefetch = 0 : i64, scratch_operands = 0 : i64, tpu.core_type = #tpu.core_type<tc>, window_params = [{transform_indices = @transform_0, window_bounds = array<i64: 1, 8, 256>}, {pipeline_mode = #tpu.pipeline_mode<synchronous>, transform_indices = @transform_1, window_bounds = array<i64: 8, 1>}, {pipeline_mode = #tpu.pipeline_mode<synchronous>, transform_indices = @transform_2, window_bounds = array<i64: 8, 1>}, {pipeline_mode = #tpu.pipeline_mode<synchronous>, transform_indices = @transform_3, window_bounds = array<i64: 16, 8>}, {transform_indices = @transform_4, window_bounds = array<i64: 1, 16, 256>}, {transform_indices = @transform_5, window_bounds = array<i64: 1, 16, 1>}, {transform_indices = @transform_6, window_bounds = array<i64: 1, 16, 1>}]} {
    %c0 = arith.constant 0 : index
    %c0_0 = arith.constant 0 : index
    %c0_1 = arith.constant 0 : index
    %0 = vector.load %arg1[%c0, %c0_0, %c0_1] : memref<1x8x256xf32, #tpu.memory_space<vmem>>, vector<1x8x256xf32>
    %1 = vector.shape_cast %0 : vector<1x8x256xf32> to vector<8x256xf32>
    %c0_2 = arith.constant 0 : index
    %c0_3 = arith.constant 0 : index
    %2 = vector.load %arg2[%c0_2, %c0_3] : memref<8x1xf32, #tpu.memory_space<vmem>>, vector<8x1xf32>
    %3 = vector.broadcast %2 : vector<8x1xf32> to vector<8x256xf32>
    %4 = arith.mulf %1, %3 : vector<8x256xf32>
    %c0_4 = arith.constant 0 : index
    %c0_5 = arith.constant 0 : index
    %5 = vector.load %arg3[%c0_4, %c0_5] : memref<8x1xf32, #tpu.memory_space<vmem>>, vector<8x1xf32>
    %6 = vector.broadcast %5 : vector<8x1xf32> to vector<8x256xf32>
    %7 = arith.addf %4, %6 : vector<8x256xf32>
    %cst = arith.constant 0.000000e+00 : f32
    %8 = vector.broadcast %cst : f32 to vector<8x256xf32>
    %9 = arith.maximumf %7, %8 : vector<8x256xf32>
    %c0_6 = arith.constant 0 : index
    %c0_7 = arith.constant 0 : index
    %10 = vector.load %arg4[%c0_6, %c0_7] : memref<16x8xbf16, #tpu.memory_space<vmem>>, vector<16x8xbf16>
    %11 = arith.truncf %9 : vector<8x256xf32> to vector<8x256xbf16>
    %cst_8 = arith.constant dense<0.000000e+00> : vector<16x256xf32>
    %12 = tpu.matmul %10, %11, %cst_8 {dimension_numbers = #tpu.dot_dimension_numbers<[1], [0], [0], [1], [0, 0, 1, 1], [], []>} : vector<16x8xbf16>, vector<8x256xbf16>, vector<16x256xf32> -> vector<16x256xf32>
    %c0_9 = arith.constant 0 : index
    %c0_10 = arith.constant 0 : index
    %c0_11 = arith.constant 0 : index
    %13 = vector.load %arg5[%c0_9, %c0_10, %c0_11] : memref<1x16x256xf32, #tpu.memory_space<vmem>>, vector<1x16x256xf32>
    %14 = vector.shape_cast %13 : vector<1x16x256xf32> to vector<16x256xf32>
    %15 = vector.shape_cast %12 : vector<16x256xf32> to vector<1x16x256xf32>
    tpu.vector_store %arg5[%c0_9, %c0_10, %c0_11], %15 {strides = array<i32>} : memref<1x16x256xf32, #tpu.memory_space<vmem>>, vector<1x16x256xf32>,
    %cst_12 = arith.constant dense<0.000000e+00> : vector<16xf32>
    %16 = vector.multi_reduction <add>, %12, %cst_12 [1] : vector<16x256xf32> to vector<16xf32>
    %17 = vector.shape_cast %16 : vector<16xf32> to vector<16x1xf32>
    %c0_13 = arith.constant 0 : index
    %c0_14 = arith.constant 0 : index
    %c0_15 = arith.constant 0 : index
    %18 = vector.load %arg6[%c0_13, %c0_14, %c0_15] : memref<1x16x1xf32, #tpu.memory_space<vmem>>, vector<1x16x1xf32>
    %19 = vector.shape_cast %18 : vector<1x16x1xf32> to vector<16x1xf32>
    %20 = vector.shape_cast %17 : vector<16x1xf32> to vector<1x16x1xf32>
    tpu.vector_store %arg6[%c0_13, %c0_14, %c0_15], %20 {strides = array<i32>} : memref<1x16x1xf32, #tpu.memory_space<vmem>>, vector<1x16x1xf32>,
    %21 = arith.mulf %12, %12 : vector<16x256xf32>
    %cst_16 = arith.constant dense<0.000000e+00> : vector<16xf32>
    %22 = vector.multi_reduction <add>, %21, %cst_16 [1] : vector<16x256xf32> to vector<16xf32>
    %23 = vector.shape_cast %22 : vector<16xf32> to vector<16x1xf32>
    %c0_17 = arith.constant 0 : index
    %c0_18 = arith.constant 0 : index
    %c0_19 = arith.constant 0 : index
    %24 = vector.load %arg7[%c0_17, %c0_18, %c0_19] : memref<1x16x1xf32, #tpu.memory_space<vmem>>, vector<1x16x1xf32>
    %25 = vector.shape_cast %24 : vector<1x16x1xf32> to vector<16x1xf32>
    %26 = vector.shape_cast %23 : vector<16x1xf32> to vector<1x16x1xf32>
    tpu.vector_store %arg7[%c0_17, %c0_18, %c0_19], %26 {strides = array<i32>} : memref<1x16x1xf32, #tpu.memory_space<vmem>>, vector<1x16x1xf32>,
    return
  }
  func.func @transform_0(%arg0: i32) -> (i32, i32, i32) {
    %c0_i32 = arith.constant 0 : i32
    %c0_i32_0 = arith.constant 0 : i32
    %c0_i32_1 = arith.constant 0 : i32
    return %arg0, %c0_i32, %c0_i32_0 : i32, i32, i32
  }
  func.func @transform_1(%arg0: i32) -> (i32, i32) {
    %c0_i32 = arith.constant 0 : i32
    %c0_i32_0 = arith.constant 0 : i32
    %c0_i32_1 = arith.constant 0 : i32
    return %c0_i32, %c0_i32_0 : i32, i32
  }
  func.func @transform_2(%arg0: i32) -> (i32, i32) {
    %c0_i32 = arith.constant 0 : i32
    %c0_i32_0 = arith.constant 0 : i32
    %c0_i32_1 = arith.constant 0 : i32
    return %c0_i32, %c0_i32_0 : i32, i32
  }
  func.func @transform_3(%arg0: i32) -> (i32, i32) {
    %c0_i32 = arith.constant 0 : i32
    %c0_i32_0 = arith.constant 0 : i32
    %c0_i32_1 = arith.constant 0 : i32
    return %c0_i32, %c0_i32_0 : i32, i32
  }
  func.func @transform_4(%arg0: i32) -> (i32, i32, i32) {
    %c0_i32 = arith.constant 0 : i32
    %c0_i32_0 = arith.constant 0 : i32
    %c0_i32_1 = arith.constant 0 : i32
    return %arg0, %c0_i32, %c0_i32_0 : i32, i32, i32
  }
  func.func @transform_5(%arg0: i32) -> (i32, i32, i32) {
    %c0_i32 = arith.constant 0 : i32
    %c0_i32_0 = arith.constant 0 : i32
    %c0_i32_1 = arith.constant 0 : i32
    return %arg0, %c0_i32, %c0_i32_0 : i32, i32, i32
  }
  func.func @transform_6(%arg0: i32) -> (i32, i32, i32) {
    %c0_i32 = arith.constant 0 : i32
    %c0_i32_0 = arith.constant 0 : i32
    %c0_i32_1 = arith.constant 0 : i32
    return %arg0, %c0_i32, %c0_i32_0 : i32, i32, i32
  }
}

module attributes {stable_mosaic.version = 11 : i64} {
  func.func @_conv2_kernel(%arg0: i32, %arg1: memref<1x8x256xf32, #tpu.memory_space<vmem>>, %arg2: memref<8x1xf32, #tpu.memory_space<vmem>>, %arg3: memref<8x1xf32, #tpu.memory_space<vmem>>, %arg4: memref<8x72xbf16, #tpu.memory_space<vmem>>, %arg5: memref<1x8x256xf32, #tpu.memory_space<vmem>>, %arg6: memref<1x8x1xf32, #tpu.memory_space<vmem>>, %arg7: memref<1x8x1xf32, #tpu.memory_space<vmem>>) attributes {dimension_semantics = [#tpu.dimension_semantics<parallel>], iteration_bounds = array<i64: 2>, scalar_prefetch = 0 : i64, scratch_operands = 0 : i64, tpu.core_type = #tpu.core_type<tc>, window_params = [{transform_indices = @transform_0, window_bounds = array<i64: 1, 8, 256>}, {pipeline_mode = #tpu.pipeline_mode<synchronous>, transform_indices = @transform_1, window_bounds = array<i64: 8, 1>}, {pipeline_mode = #tpu.pipeline_mode<synchronous>, transform_indices = @transform_2, window_bounds = array<i64: 8, 1>}, {pipeline_mode = #tpu.pipeline_mode<synchronous>, transform_indices = @transform_3, window_bounds = array<i64: 8, 72>}, {transform_indices = @transform_4, window_bounds = array<i64: 1, 8, 256>}, {transform_indices = @transform_5, window_bounds = array<i64: 1, 8, 1>}, {transform_indices = @transform_6, window_bounds = array<i64: 1, 8, 1>}]} {
    %c0 = arith.constant 0 : index
    %c0_0 = arith.constant 0 : index
    %c0_1 = arith.constant 0 : index
    %0 = vector.load %arg1[%c0, %c0_0, %c0_1] : memref<1x8x256xf32, #tpu.memory_space<vmem>>, vector<1x8x256xf32>
    %1 = vector.shape_cast %0 : vector<1x8x256xf32> to vector<8x256xf32>
    %c0_2 = arith.constant 0 : index
    %c0_3 = arith.constant 0 : index
    %2 = vector.load %arg2[%c0_2, %c0_3] : memref<8x1xf32, #tpu.memory_space<vmem>>, vector<8x1xf32>
    %3 = vector.broadcast %2 : vector<8x1xf32> to vector<8x256xf32>
    %4 = arith.mulf %1, %3 : vector<8x256xf32>
    %c0_4 = arith.constant 0 : index
    %c0_5 = arith.constant 0 : index
    %5 = vector.load %arg3[%c0_4, %c0_5] : memref<8x1xf32, #tpu.memory_space<vmem>>, vector<8x1xf32>
    %6 = vector.broadcast %5 : vector<8x1xf32> to vector<8x256xf32>
    %7 = arith.addf %4, %6 : vector<8x256xf32>
    %cst = arith.constant 0.000000e+00 : f32
    %8 = vector.broadcast %cst : f32 to vector<8x256xf32>
    %9 = arith.maximumf %7, %8 : vector<8x256xf32>
    %cst_6 = arith.constant 0.000000e+00 : f32
    %10 = vector.broadcast %cst_6 : f32 to vector<8x128xf32>
    %11 = tpu.concatenate %10, %9, %10 in 1 : vector<8x128xf32>, vector<8x256xf32>, vector<8x128xf32> -> vector<8x512xf32>
    %12 = tpu.iota {dimensions = array<i32: 1>} : vector<1x256xi32>
    %c16_i32 = arith.constant 16 : i32
    %c0_i32 = arith.constant 0 : i32
    %13 = arith.cmpi eq, %c16_i32, %c0_i32 : i32
    %c1_i32 = arith.constant 1 : i32
    %14 = arith.select %13, %c1_i32, %c16_i32 : i32
    %15 = vector.broadcast %14 : i32 to vector<1x256xi32>
    %16 = arith.remsi %12, %15 : vector<1x256xi32>
    %c0_i32_7 = arith.constant 0 : i32
    %17 = vector.broadcast %c0_i32_7 : i32 to vector<1x256xi32>
    %18 = arith.cmpi ne, %16, %17 : vector<1x256xi32>
    %c0_i32_8 = arith.constant 0 : i32
    %19 = vector.broadcast %c0_i32_8 : i32 to vector<1x256xi32>
    %20 = arith.cmpi slt, %16, %19 : vector<1x256xi32>
    %c0_i32_9 = arith.constant 0 : i32
    %21 = arith.cmpi slt, %14, %c0_i32_9 : i32
    %22 = vector.broadcast %21 : i1 to vector<1x256xi1>
    %23 = vector.broadcast %22 : vector<1x256xi1> to vector<1x256xi1>
    %24 = arith.xori %20, %23 : vector<1x256xi1>
    %25 = arith.andi %24, %18 : vector<1x256xi1>
    %26 = vector.broadcast %14 : i32 to vector<1x256xi32>
    %27 = arith.addi %16, %26 : vector<1x256xi32>
    %28 = arith.select %25, %27, %16 : vector<1x256xi1>, vector<1x256xi32>
    %c16_i32_10 = arith.constant 16 : i32
    %29 = vector.broadcast %c16_i32_10 : i32 to vector<1x256xi32>
    %30 = arith.cmpi sge, %12, %29 : vector<1x256xi32>
    %c240_i32 = arith.constant 240 : i32
    %31 = vector.broadcast %c240_i32 : i32 to vector<1x256xi32>
    %32 = arith.cmpi slt, %12, %31 : vector<1x256xi32>
    %c1_i32_11 = arith.constant 1 : i32
    %33 = vector.broadcast %c1_i32_11 : i32 to vector<1x256xi32>
    %34 = arith.cmpi sge, %28, %33 : vector<1x256xi32>
    %c14_i32 = arith.constant 14 : i32
    %35 = vector.broadcast %c14_i32 : i32 to vector<1x256xi32>
    %36 = arith.cmpi sle, %28, %35 : vector<1x256xi32>
    %37 = vector.extract_strided_slice %11 {offsets = [0, 111], sizes = [8, 256], strides = [1, 1]} : vector<8x512xf32> to vector<8x256xf32>
    %38 = arith.andi %30, %34 : vector<1x256xi1>
    %cst_12 = arith.constant 0.000000e+00 : f32
    %39 = vector.shape_cast %38 : vector<1x256xi1> to vector<1x256xi1>
    %40 = vector.broadcast %39 : vector<1x256xi1> to vector<8x256xi1>
    %41 = vector.broadcast %cst_12 : f32 to vector<8x256xf32>
    %42 = arith.select %40, %37, %41 : vector<8x256xi1>, vector<8x256xf32>
    %43 = vector.extract_strided_slice %11 {offsets = [0, 112], sizes = [8, 256], strides = [1, 1]} : vector<8x512xf32> to vector<8x256xf32>
    %cst_13 = arith.constant 0.000000e+00 : f32
    %44 = vector.shape_cast %30 : vector<1x256xi1> to vector<1x256xi1>
    %45 = vector.broadcast %44 : vector<1x256xi1> to vector<8x256xi1>
    %46 = vector.broadcast %cst_13 : f32 to vector<8x256xf32>
    %47 = arith.select %45, %43, %46 : vector<8x256xi1>, vector<8x256xf32>
    %48 = vector.extract_strided_slice %11 {offsets = [0, 113], sizes = [8, 256], strides = [1, 1]} : vector<8x512xf32> to vector<8x256xf32>
    %49 = arith.andi %30, %36 : vector<1x256xi1>
    %cst_14 = arith.constant 0.000000e+00 : f32
    %50 = vector.shape_cast %49 : vector<1x256xi1> to vector<1x256xi1>
    %51 = vector.broadcast %50 : vector<1x256xi1> to vector<8x256xi1>
    %52 = vector.broadcast %cst_14 : f32 to vector<8x256xf32>
    %53 = arith.select %51, %48, %52 : vector<8x256xi1>, vector<8x256xf32>
    %54 = vector.extract_strided_slice %11 {offsets = [0, 127], sizes = [8, 256], strides = [1, 1]} : vector<8x512xf32> to vector<8x256xf32>
    %cst_15 = arith.constant 0.000000e+00 : f32
    %55 = vector.shape_cast %34 : vector<1x256xi1> to vector<1x256xi1>
    %56 = vector.broadcast %55 : vector<1x256xi1> to vector<8x256xi1>
    %57 = vector.broadcast %cst_15 : f32 to vector<8x256xf32>
    %58 = arith.select %56, %54, %57 : vector<8x256xi1>, vector<8x256xf32>
    %59 = vector.extract_strided_slice %11 {offsets = [0, 128], sizes = [8, 256], strides = [1, 1]} : vector<8x512xf32> to vector<8x256xf32>
    %60 = vector.extract_strided_slice %11 {offsets = [0, 129], sizes = [8, 256], strides = [1, 1]} : vector<8x512xf32> to vector<8x256xf32>
    %cst_16 = arith.constant 0.000000e+00 : f32
    %61 = vector.shape_cast %36 : vector<1x256xi1> to vector<1x256xi1>
    %62 = vector.broadcast %61 : vector<1x256xi1> to vector<8x256xi1>
    %63 = vector.broadcast %cst_16 : f32 to vector<8x256xf32>
    %64 = arith.select %62, %60, %63 : vector<8x256xi1>, vector<8x256xf32>
    %65 = vector.extract_strided_slice %11 {offsets = [0, 143], sizes = [8, 256], strides = [1, 1]} : vector<8x512xf32> to vector<8x256xf32>
    %66 = arith.andi %32, %34 : vector<1x256xi1>
    %cst_17 = arith.constant 0.000000e+00 : f32
    %67 = vector.shape_cast %66 : vector<1x256xi1> to vector<1x256xi1>
    %68 = vector.broadcast %67 : vector<1x256xi1> to vector<8x256xi1>
    %69 = vector.broadcast %cst_17 : f32 to vector<8x256xf32>
    %70 = arith.select %68, %65, %69 : vector<8x256xi1>, vector<8x256xf32>
    %71 = vector.extract_strided_slice %11 {offsets = [0, 144], sizes = [8, 256], strides = [1, 1]} : vector<8x512xf32> to vector<8x256xf32>
    %cst_18 = arith.constant 0.000000e+00 : f32
    %72 = vector.shape_cast %32 : vector<1x256xi1> to vector<1x256xi1>
    %73 = vector.broadcast %72 : vector<1x256xi1> to vector<8x256xi1>
    %74 = vector.broadcast %cst_18 : f32 to vector<8x256xf32>
    %75 = arith.select %73, %71, %74 : vector<8x256xi1>, vector<8x256xf32>
    %76 = vector.extract_strided_slice %11 {offsets = [0, 145], sizes = [8, 256], strides = [1, 1]} : vector<8x512xf32> to vector<8x256xf32>
    %77 = arith.andi %32, %36 : vector<1x256xi1>
    %cst_19 = arith.constant 0.000000e+00 : f32
    %78 = vector.shape_cast %77 : vector<1x256xi1> to vector<1x256xi1>
    %79 = vector.broadcast %78 : vector<1x256xi1> to vector<8x256xi1>
    %80 = vector.broadcast %cst_19 : f32 to vector<8x256xf32>
    %81 = arith.select %79, %76, %80 : vector<8x256xi1>, vector<8x256xf32>
    %82 = tpu.concatenate %42, %47, %53, %58, %59, %64, %70, %75, %81 in 0 : vector<8x256xf32>, vector<8x256xf32>, vector<8x256xf32>, vector<8x256xf32>, vector<8x256xf32>, vector<8x256xf32>, vector<8x256xf32>, vector<8x256xf32>, vector<8x256xf32> -> vector<72x256xf32>
    %83 = arith.truncf %82 : vector<72x256xf32> to vector<72x256xbf16>
    %c0_20 = arith.constant 0 : index
    %c0_21 = arith.constant 0 : index
    %84 = vector.load %arg4[%c0_20, %c0_21] : memref<8x72xbf16, #tpu.memory_space<vmem>>, vector<8x72xbf16>
    %cst_22 = arith.constant dense<0.000000e+00> : vector<8x256xf32>
    %85 = tpu.matmul %84, %83, %cst_22 {dimension_numbers = #tpu.dot_dimension_numbers<[1], [0], [0], [1], [0, 0, 1, 1], [], []>} : vector<8x72xbf16>, vector<72x256xbf16>, vector<8x256xf32> -> vector<8x256xf32>
    %c0_23 = arith.constant 0 : index
    %c0_24 = arith.constant 0 : index
    %c0_25 = arith.constant 0 : index
    %86 = vector.load %arg5[%c0_23, %c0_24, %c0_25] : memref<1x8x256xf32, #tpu.memory_space<vmem>>, vector<1x8x256xf32>
    %87 = vector.shape_cast %86 : vector<1x8x256xf32> to vector<8x256xf32>
    %88 = vector.shape_cast %85 : vector<8x256xf32> to vector<1x8x256xf32>
    tpu.vector_store %arg5[%c0_23, %c0_24, %c0_25], %88 {strides = array<i32>} : memref<1x8x256xf32, #tpu.memory_space<vmem>>, vector<1x8x256xf32>,
    %cst_26 = arith.constant dense<0.000000e+00> : vector<8xf32>
    %89 = vector.multi_reduction <add>, %85, %cst_26 [1] : vector<8x256xf32> to vector<8xf32>
    %90 = vector.shape_cast %89 : vector<8xf32> to vector<8x1xf32>
    %c0_27 = arith.constant 0 : index
    %c0_28 = arith.constant 0 : index
    %c0_29 = arith.constant 0 : index
    %91 = vector.load %arg6[%c0_27, %c0_28, %c0_29] : memref<1x8x1xf32, #tpu.memory_space<vmem>>, vector<1x8x1xf32>
    %92 = vector.shape_cast %91 : vector<1x8x1xf32> to vector<8x1xf32>
    %93 = vector.shape_cast %90 : vector<8x1xf32> to vector<1x8x1xf32>
    tpu.vector_store %arg6[%c0_27, %c0_28, %c0_29], %93 {strides = array<i32>} : memref<1x8x1xf32, #tpu.memory_space<vmem>>, vector<1x8x1xf32>,
    %94 = arith.mulf %85, %85 : vector<8x256xf32>
    %cst_30 = arith.constant dense<0.000000e+00> : vector<8xf32>
    %95 = vector.multi_reduction <add>, %94, %cst_30 [1] : vector<8x256xf32> to vector<8xf32>
    %96 = vector.shape_cast %95 : vector<8xf32> to vector<8x1xf32>
    %c0_31 = arith.constant 0 : index
    %c0_32 = arith.constant 0 : index
    %c0_33 = arith.constant 0 : index
    %97 = vector.load %arg7[%c0_31, %c0_32, %c0_33] : memref<1x8x1xf32, #tpu.memory_space<vmem>>, vector<1x8x1xf32>
    %98 = vector.shape_cast %97 : vector<1x8x1xf32> to vector<8x1xf32>
    %99 = vector.shape_cast %96 : vector<8x1xf32> to vector<1x8x1xf32>
    tpu.vector_store %arg7[%c0_31, %c0_32, %c0_33], %99 {strides = array<i32>} : memref<1x8x1xf32, #tpu.memory_space<vmem>>, vector<1x8x1xf32>,
    return
  }
  func.func @transform_0(%arg0: i32) -> (i32, i32, i32) {
    %c0_i32 = arith.constant 0 : i32
    %c0_i32_0 = arith.constant 0 : i32
    %c0_i32_1 = arith.constant 0 : i32
    return %arg0, %c0_i32, %c0_i32_0 : i32, i32, i32
  }
  func.func @transform_1(%arg0: i32) -> (i32, i32) {
    %c0_i32 = arith.constant 0 : i32
    %c0_i32_0 = arith.constant 0 : i32
    %c0_i32_1 = arith.constant 0 : i32
    return %c0_i32, %c0_i32_0 : i32, i32
  }
  func.func @transform_2(%arg0: i32) -> (i32, i32) {
    %c0_i32 = arith.constant 0 : i32
    %c0_i32_0 = arith.constant 0 : i32
    %c0_i32_1 = arith.constant 0 : i32
    return %c0_i32, %c0_i32_0 : i32, i32
  }
  func.func @transform_3(%arg0: i32) -> (i32, i32) {
    %c0_i32 = arith.constant 0 : i32
    %c0_i32_0 = arith.constant 0 : i32
    %c0_i32_1 = arith.constant 0 : i32
    return %c0_i32, %c0_i32_0 : i32, i32
  }
  func.func @transform_4(%arg0: i32) -> (i32, i32, i32) {
    %c0_i32 = arith.constant 0 : i32
    %c0_i32_0 = arith.constant 0 : i32
    %c0_i32_1 = arith.constant 0 : i32
    return %arg0, %c0_i32, %c0_i32_0 : i32, i32, i32
  }
  func.func @transform_5(%arg0: i32) -> (i32, i32, i32) {
    %c0_i32 = arith.constant 0 : i32
    %c0_i32_0 = arith.constant 0 : i32
    %c0_i32_1 = arith.constant 0 : i32
    return %arg0, %c0_i32, %c0_i32_0 : i32, i32, i32
  }
  func.func @transform_6(%arg0: i32) -> (i32, i32, i32) {
    %c0_i32 = arith.constant 0 : i32
    %c0_i32_0 = arith.constant 0 : i32
    %c0_i32_1 = arith.constant 0 : i32
    return %arg0, %c0_i32, %c0_i32_0 : i32, i32, i32
  }
}

module attributes {stable_mosaic.version = 11 : i64} {
  func.func @_residual_kernel(%arg0: i32, %arg1: memref<1x16x256xf32, #tpu.memory_space<vmem>>, %arg2: memref<1x16x256xf32, #tpu.memory_space<vmem>>, %arg3: memref<16x1xf32, #tpu.memory_space<vmem>>, %arg4: memref<16x1xf32, #tpu.memory_space<vmem>>, %arg5: memref<1x16x256xf32, #tpu.memory_space<vmem>>) attributes {dimension_semantics = [#tpu.dimension_semantics<parallel>], iteration_bounds = array<i64: 2>, scalar_prefetch = 0 : i64, scratch_operands = 0 : i64, tpu.core_type = #tpu.core_type<tc>, window_params = [{transform_indices = @transform_0, window_bounds = array<i64: 1, 16, 256>}, {transform_indices = @transform_1, window_bounds = array<i64: 1, 16, 256>}, {pipeline_mode = #tpu.pipeline_mode<synchronous>, transform_indices = @transform_2, window_bounds = array<i64: 16, 1>}, {pipeline_mode = #tpu.pipeline_mode<synchronous>, transform_indices = @transform_3, window_bounds = array<i64: 16, 1>}, {transform_indices = @transform_4, window_bounds = array<i64: 1, 16, 256>}]} {
    %c0 = arith.constant 0 : index
    %c0_0 = arith.constant 0 : index
    %c0_1 = arith.constant 0 : index
    %0 = vector.load %arg1[%c0, %c0_0, %c0_1] : memref<1x16x256xf32, #tpu.memory_space<vmem>>, vector<1x16x256xf32>
    %1 = vector.shape_cast %0 : vector<1x16x256xf32> to vector<16x256xf32>
    %c0_2 = arith.constant 0 : index
    %c0_3 = arith.constant 0 : index
    %2 = vector.load %arg3[%c0_2, %c0_3] : memref<16x1xf32, #tpu.memory_space<vmem>>, vector<16x1xf32>
    %3 = vector.broadcast %2 : vector<16x1xf32> to vector<16x256xf32>
    %4 = arith.mulf %1, %3 : vector<16x256xf32>
    %c0_4 = arith.constant 0 : index
    %c0_5 = arith.constant 0 : index
    %5 = vector.load %arg4[%c0_4, %c0_5] : memref<16x1xf32, #tpu.memory_space<vmem>>, vector<16x1xf32>
    %6 = vector.broadcast %5 : vector<16x1xf32> to vector<16x256xf32>
    %7 = arith.addf %4, %6 : vector<16x256xf32>
    %c0_6 = arith.constant 0 : index
    %c0_7 = arith.constant 0 : index
    %c0_8 = arith.constant 0 : index
    %8 = vector.load %arg2[%c0_6, %c0_7, %c0_8] : memref<1x16x256xf32, #tpu.memory_space<vmem>>, vector<1x16x256xf32>
    %9 = vector.shape_cast %8 : vector<1x16x256xf32> to vector<16x256xf32>
    %10 = arith.addf %7, %9 : vector<16x256xf32>
    %cst = arith.constant 0.000000e+00 : f32
    %11 = vector.broadcast %cst : f32 to vector<16x256xf32>
    %12 = arith.maximumf %10, %11 : vector<16x256xf32>
    %c0_9 = arith.constant 0 : index
    %c0_10 = arith.constant 0 : index
    %c0_11 = arith.constant 0 : index
    %13 = vector.load %arg5[%c0_9, %c0_10, %c0_11] : memref<1x16x256xf32, #tpu.memory_space<vmem>>, vector<1x16x256xf32>
    %14 = vector.shape_cast %13 : vector<1x16x256xf32> to vector<16x256xf32>
    %15 = vector.shape_cast %12 : vector<16x256xf32> to vector<1x16x256xf32>
    tpu.vector_store %arg5[%c0_9, %c0_10, %c0_11], %15 {strides = array<i32>} : memref<1x16x256xf32, #tpu.memory_space<vmem>>, vector<1x16x256xf32>,
    return
  }
  func.func @transform_0(%arg0: i32) -> (i32, i32, i32) {
    %c0_i32 = arith.constant 0 : i32
    %c0_i32_0 = arith.constant 0 : i32
    %c0_i32_1 = arith.constant 0 : i32
    return %arg0, %c0_i32, %c0_i32_0 : i32, i32, i32
  }
  func.func @transform_1(%arg0: i32) -> (i32, i32, i32) {
    %c0_i32 = arith.constant 0 : i32
    %c0_i32_0 = arith.constant 0 : i32
    %c0_i32_1 = arith.constant 0 : i32
    return %arg0, %c0_i32, %c0_i32_0 : i32, i32, i32
  }
  func.func @transform_2(%arg0: i32) -> (i32, i32) {
    %c0_i32 = arith.constant 0 : i32
    %c0_i32_0 = arith.constant 0 : i32
    %c0_i32_1 = arith.constant 0 : i32
    return %c0_i32, %c0_i32_0 : i32, i32
  }
  func.func @transform_3(%arg0: i32) -> (i32, i32) {
    %c0_i32 = arith.constant 0 : i32
    %c0_i32_0 = arith.constant 0 : i32
    %c0_i32_1 = arith.constant 0 : i32
    return %c0_i32, %c0_i32_0 : i32, i32
  }
  func.func @transform_4(%arg0: i32) -> (i32, i32, i32) {
    %c0_i32 = arith.constant 0 : i32
    %c0_i32_0 = arith.constant 0 : i32
    %c0_i32_1 = arith.constant 0 : i32
    return %arg0, %c0_i32, %c0_i32_0 : i32, i32, i32
  }
}

</mosaic_0001>

<bundles_post_ra>
// kernel: resblock_forward.4
= control target key start
LH: loop header
LB: loop body
LE: loop exit
PB: predicated region body
PF: predicated region fallthrough
CT: control target
= control target key end

     0   :  { %s461_s15 = smov 0   ;;  %s492_s0 = inlined_call_operand.vmem [shape: f32[2,16,256], index: 0, kind: input, shape index: {}]   ;;  %s493_s1 = inlined_call_operand.vmem [shape: bf16[8,16], index: 1, kind: input, shape index: {}]   ;;  %s494_s2 = inlined_call_operand.vmem [shape: f32[2,8,256], index: 2, kind: output, shape index: {0}]   ;;  %s495_s3 = inlined_call_operand.vmem [shape: f32[2,8,1], index: 3, kind: output, shape index: {1}]   ;;  %s496_s4 = inlined_call_operand.vmem [shape: f32[2,8,1], index: 4, kind: output, shape index: {2}]  }
   0x1 LB: > { %s402_s16 = sadd.s32 4294967295, %s433_s15   ;;  %p406_p0 = scmp.ge.s32.totalorder %s433_s15, 1  ;;  %s433_s15 = sphi %s461_s15, %s15_s15  }
   0x2   : > { %p167_p1 = scmp.lt.s32.totalorder %s433_s15, 3 }
   0x4   : > { %p168_p2 = pnand %p406_p0, %p167_p1 }
   0x5   : > { %p201_p3 = scmp.lt.s32.totalorder (!%p168_p2), %s402_s16, 1  ;;  %v435_v0 = vmov (!%p168_p2), 0   ;;  %v226_v7 = vld [vmem:[%s493_s1] sm:$0xf] (!%p168_p2)  ;;  %vm227_vm0 = vcmask (!%p168_p2), 130048   ;;  %vm277_vm1 = vcmask (!%p168_p2), 7168  }
   0x6   : > { %171 = sbr.rel (%p168_p2) target bundleno = 385 (0x181), region = 28  ;;  %263 = vmatprep.mubr.bf16.mxu0 (!%p168_p2), %v435_v0 }
   0xd   : > { %s498_s16 = smov (!%p201_p3, %s402_s16), 1 }
   0xe   : > { %s416_s17 = sshll.u32 %s498_s16, 5  ;;  %s417_s23 = sshll.u32 %s498_s16, 4 }
   0xf   : > { %s205_s20 = scalar_lea.vmem %s492_s0, %s416_s17  ;;  %s210_s26 = scalar_lea.vmem %s494_s2, %s417_s23 }
  0x10   : > { %v221_v1 = vld [vmem:[%s205_s20 + $0x8] sm:$0xff]  ;;  %v223_v2 = vld [vmem:[%s205_s20 + $0x18] sm:$0xff]  ;;  %v220_v3 = vld [vmem:[%s205_s20] sm:$0xff]  ;;  %s411_s27 = sshll.u32 %s498_s16, 3 }
  0x11   : > { %v225_v4 = vpack.c.bf16 %v223_v2, %v221_v1  ;;  %v222_v5 = vld [vmem:[%s205_s20 + $0x10] sm:$0xff]  ;;  %s214_s30 = scalar_lea.vmem %s495_s3, %s411_s27  ;;  %s218_s7 = scalar_lea.vmem %s496_s4, %s411_s27 }
  0x12   : > { %v224_v6 = vpack.c.bf16 %v222_v5, %v220_v3 }
  0x13   : > { %231 = vmatprep.subr.bf16.mxu0 %v225_v4 }
  0x14   : > { %232 = vmatpush1.bf16.msra.mxu0 %v224_v6 }
  0x17   : > { %413 = vmatmul.mubr.msk.bf16.vlgmr.msra.gmra.mrb[0].mxu0 %vm227_vm0, %v226_v7 }
  0xea   : > { %v265_v8 = vpop.f32.mrb[0].mxu0 }
  0xeb   : > { %272 = vst [vmem:[%s210_s26] sm:$0xff] %v265_v8  ;;  %v267_v9 = vpop.f32.mrb[1].mxu0  ;;  %v279_v10 = vmul.f32 %v265_v8, %v265_v8 }
  0xec   : > { %273 = vst [vmem:[%s210_s26 + $0x8] sm:$0xff] %v267_v9  ;;  %v269_v11 = vpop.f32.mrb[2].mxu0  ;;  %v274_v12 = vadd.f32 %v267_v9, %v265_v8  ;;  %v280_v13 = vmul.f32 %v267_v9, %v267_v9 }
  0xed   : > { %v270_v14 = vpop.f32.mrb[3].mxu0 }
  0xee   : > { %275 = vadd.xlane.f32.xlu0 %v274_v12  ;;  %v281_v15 = vadd.f32 %v280_v13, %v279_v10 }
  0xf2   : > { %282 = vadd.xlane.f32.xlu0 %v281_v15 }
 0x17b   : > { %v276_v16 = vpop.xlane.xlu0 %275 }
 0x17c   : > { %278 = vst.msk [vmem:[%s214_s30] sm:$0xff] %vm277_vm1, %v276_v16 }
 0x17f   : > { %v283_v17 = vpop.xlane.xlu0 %282 }
 0x180   : > { %284 = vst.msk [vmem:[%s218_s7] sm:$0xff] %vm277_vm1, %v283_v17 }
 0x181 PF: > { %s15_s15 = sadd.s32 1, %s433_s15  }
 0x182   : > { %p12_p4 = scmp.ge.s32.totalorder %s15_s15, 4  }
 0x184   :  { %14 = sbr.rel (!%p12_p4) target bundleno = 1 (0x1), region = 82 }

// kernel: resblock_forward.5
= control target key start
LH: loop header
LB: loop body
LE: loop exit
PB: predicated region body
PF: predicated region fallthrough
CT: control target
= control target key end

     0   :  { %s823_s21 = smov 0   ;;  %s958_s0 = inlined_call_operand.vmem [shape: f32[2,8,256], index: 0, kind: input, shape index: {}]   ;;  %s959_s1 = inlined_call_operand.vmem [shape: f32[8,1], index: 1, kind: input, shape index: {}]   ;;  %s960_s2 = inlined_call_operand.vmem [shape: f32[8,1], index: 2, kind: input, shape index: {}]   ;;  %s961_s3 = inlined_call_operand.vmem [shape: bf16[8,72], index: 3, kind: input, shape index: {}]   ;;  %s962_s4 = inlined_call_operand.vmem [shape: f32[2,8,256], index: 4, kind: output, shape index: {0}]   ;;  %s963_s5 = inlined_call_operand.vmem [shape: f32[2,8,1], index: 5, kind: output, shape index: {1}]   ;;  %s964_s6 = inlined_call_operand.vmem [shape: f32[2,8,1], index: 6, kind: output, shape index: {2}]  }
   0x1 LB: > { %s668_s22 = sadd.s32 4294967295, %s775_s21   ;;  %p672_p0 = scmp.ge.s32.totalorder %s775_s21, 1  ;;  %s775_s21 = sphi %s823_s21, %s17_s21  }
   0x2   : > { %p217_p1 = scmp.lt.s32.totalorder %s775_s21, 3 }
   0x4   : > { %p218_p2 = pnand %p672_p0, %p217_p1 }
   0x5   : > { %v276_v0 = vld [vmem:[%s959_s1] sm:$0xff] (!%p218_p2)  ;;  %v777_v1 = vmov (!%p218_p2), 0   ;;  %v778_v3 = vmov (!%p218_p2), 0.0   ;;  %s779_s27 = smov (!%p218_p2), 16   ;;  %s780_s28 = smov (!%p218_p2), 1   ;;  %v294_v18 = vlaneseq (!%p218_p2)  ;;  %vm344_vm2 = vcmask (!%p218_p2), 138240  }
   0x6   : > { %221 = sbr.rel (%p218_p2) target bundleno = 652 (0x28c), region = 36  ;;  %728 = vset.pattern.permute.xlu0 (!%p218_p2), %v777_v1  ;;  %530 = vmatprep.mubr.bf16.mxu0 (!%p218_p2), %v777_v1  ;;  %v284_v2 = vld [vmem:[%s960_s2] sm:$0xff] (!%p218_p2)  ;;  %s781_s29 = smov (!%p218_p2), 17   ;;  %vm380_vm3 = vcmask (!%p218_p2), 121856   ;;  %vm361_vm5 = vcmask (!%p218_p2), 130048   ;;  %vm414_vm7 = vcmask (!%p218_p2), 1039360  }
   0x7   : > { %279 = vperm.xlu0 (!%p218_p2), %728, %v276_v0   ;;  %355 = vrot.lane.b32.xlu1 (!%p218_p2), %v778_v3, %s779_s27  ;;  %s782_s30 = smov (!%p218_p2), 15   ;;  %p255_p3 = scmp.lt.s32.totalorder (!%p218_p2), %s668_s22, 1  ;;  %v295_v19 = vand.u32 (!%p218_p2), 127, %v294_v18  ;;  %vm787_vm9 = vmmov (!%p218_p2), 1   ;;  %vm397_vm11 = vcmask (!%p218_p2), 7168  }
   0x8   : > { %s783_s11 = smov (!%p218_p2), 127   ;;  %s784_s12 = smov (!%p218_p2), 113  }
   0x9   : > { %s785_s13 = smov (!%p218_p2), 111   ;;  %s786_s14 = smov (!%p218_p2), 112   ;;  %v855_v22 = vadd.s32 (!%p218_p2), 128, %v295_v19  ;;  %v301_v23 = vand.u32 (!%p218_p2), 15, %v295_v19  ;;  %vm321_vm0 = vcmp.ge.s32.totalorder (!%p218_p2), %v295_v19, 16 }
   0xb   : > { %287 = vperm.xlu0 (!%p218_p2), %728, %v284_v2   ;;  %391 = vrot.lane.b32.xlu1 (!%p218_p2), %v778_v3, %s780_s28  ;;  %v308_v26 = vand.u32 (!%p218_p2), 15, %v855_v22  ;;  %vm858_vm1 = vcmp.ge.s32.totalorder (!%p218_p2), %v301_v23, 1  ;;  %vm873_vm8 = vcmp.le.s32.totalorder (!%p218_p2), %v301_v23, 14 }
   0xc   : > { %vm869_vm6 = vmand (!%p218_p2), %vm321_vm0, %vm858_vm1 }
   0xd   : > { %s978_s22 = smov (!%p255_p3, %s668_s22), 1  ;;  %vm862_vm4 = vcmp.ge.s32.totalorder %v308_v26, 1  ;;  %vm682_vm12 = vmpackc.low %vm321_vm0, %vm869_vm6  ;;  %vm885_vm13 = vcmp.le.s32.totalorder %v308_v26, 14  ;;  %vm433_vm6 = vcmask 924672  }
   0xe   : > { %s707_s7 = sshll.u32 %s978_s22, 4  ;;  %vm679_vm10 = vmpackc.low %vm787_vm9, %vm862_vm4  ;;  %s677_s20 = sshll.u32 %s978_s22, 3 }
   0xf   : > { %338 = vrot.lane.b32.xlu0 %v778_v3, %s781_s29  ;;  %s259_s10 = scalar_lea.vmem %s958_s0, %s707_s7  ;;  %vm892_vm14 = vmand %vm321_vm0, %vm873_vm8  ;;  %s264_s19 = scalar_lea.vmem %s962_s4, %s707_s7 }
  0x10   : > { %v274_v5 = vld [vmem:[%s259_s10] sm:$0xff]  ;;  %v275_v6 = vld [vmem:[%s259_s10 + $0x8] sm:$0xff]  ;;  %vm685_vm15 = vmpackc.low %vm862_vm4, %vm885_vm13  ;;  %s268_s25 = scalar_lea.vmem %s963_s5, %s677_s20 }
  0x11   : > { %vm688_vm0 = vmpackc.low %vm858_vm1, %vm892_vm14 }
  0x13   : > { %374 = vrot.lane.b32.xlu0 %v778_v3, %s782_s30 }
  0x79   : > { %v356_v16 = vpop.permute.xlu1 %355 }
  0x7d   : > { %v392_v20 = vpop.permute.xlu1 %391 }
  0x86   : > { %v280_v4 = vpop.permute.xlu0 %279 }
  0x87   : > { %v282_v7 = vmul.f32 %v280_v4, %v274_v5  ;;  %v283_v8 = vmul.f32 %v280_v4, %v275_v6 }
  0x8a   : > { %v288_v9 = vpop.permute.xlu0 %287 }
  0x8b   : > { %v290_v10 = vadd.f32 %v288_v9, %v282_v7  ;;  %v291_v11 = vadd.f32 %v288_v9, %v283_v8 }
  0x8d   : > { %v845_v12 = vmax.f32 %v290_v10, 0.0  ;;  %v847_v13 = vmax.f32 %v291_v11, 0.0 }
  0x8e   : > { %v339_v17 = vpop.permute.xlu0 %338 }
  0x8f   : > { %v739_v14 = vpack.i.bf16 %v847_v13, %v845_v12  ;;  %v749_v15 = vpack.i.bf16 %v778_v3, %v847_v13 }
  0x91   : > { %740 = vrot.lane.b32.xlu0 %v739_v14, %s782_s30  ;;  %730 = vrot.lane.b32.xlu1 %v739_v14, %s781_s29 }
  0x92   : > { %v375_v21 = vpop.permute.xlu0 %374 }
  0x95   : > { %750 = vrot.lane.b32.xlu0 %v749_v15, %s783_s11  ;;  %735 = vrot.lane.b32.xlu1 %v739_v14, %s779_s27 }
  0x99   : > { %755 = vrot.lane.b32.xlu0 %v749_v15, %s784_s12  ;;  %745 = vrot.lane.b32.xlu1 %v739_v14, %s780_s28  ;;  %s272_s28 = scalar_lea.vmem %s964_s6, %s677_s20 }
  0x9d   : > { %427 = vrot.lane.b32.xlu0 %v845_v12, %s784_s12  ;;  %408 = vrot.lane.b32.xlu1 %v845_v12, %s783_s11 }
  0xa1   : > { %765 = vrot.lane.b32.xlu0 %v739_v14, %s785_s13  ;;  %760 = vrot.lane.b32.xlu1 %v749_v15, %s786_s14 }
  0xa5   : > { %444 = vrot.lane.b32.xlu1 %v845_v12, %s786_s14 }
  0xa9   : > { %467 = vrot.lane.b32.xlu1 %v778_v3, %s785_s13 }
 0x103   : > { %v741_v24 = vpop.permute.xlu0 %740  ;;  %v731_v25 = vpop.permute.xlu1 %730 }
 0x104   : > { %v733_v27 = vunpack.i.h.bf16 %v731_v25  ;;  %v732_v28 = vunpack.i.l.bf16 %v731_v25  ;;  %v743_v37 = vunpack.i.h.bf16 %v741_v24  ;;  %v742_v38 = vunpack.i.l.bf16 %v741_v24  ;;  %v486_v25 = vld [vmem:[%s961_s3] sm:$0xf] }
 0x106   : > { %v346_v39 = vsel %vm344_vm2, %v732_v28, %v733_v27  ;;  %v345_v40 = vsel %vm344_vm2, %v339_v17, %v732_v28  ;;  %v381_v53 = vsel %vm380_vm3, %v375_v21, %v742_v38  ;;  %v382_v54 = vsel %vm380_vm3, %v742_v38, %v743_v37  ;;  %vm691_vm2 = vmpackc.low %vm885_vm13, %vm787_vm9 }
 0x107   : > { %v751_v30 = vpop.permute.xlu0 %750  ;;  %v736_v31 = vpop.permute.xlu1 %735  ;;  %vm324_vm3 = vcmp.lt.s32.totalorder %v855_v22, 240 }
 0x108   : > { %v738_v33 = vunpack.i.h.bf16 %v736_v31  ;;  %v737_v34 = vunpack.i.l.bf16 %v736_v31  ;;  %v753_v41 = vunpack.i.h.bf16 %v751_v30  ;;  %v752_v42 = vunpack.i.l.bf16 %v751_v30 }
 0x10a   : > { %v363_v43 = vsel %vm361_vm5, %v737_v34, %v738_v33  ;;  %v362_v44 = vsel %vm361_vm5, %v356_v16, %v737_v34  ;;  %v416_v57 = vsel %vm414_vm7, %v752_v42, %v753_v41  ;;  %vm694_vm5 = vmpackc.low %vm873_vm8, %vm787_vm9 }
 0x10b   : > { %v756_v45 = vpop.permute.xlu0 %755  ;;  %v746_v46 = vpop.permute.xlu1 %745  ;;  %v680_v47 = vpack.c.bf16 %v363_v43, %v346_v39  ;;  %v683_v48 = vpack.c.bf16 %v362_v44, %v345_v40  ;;  %v692_v63 = vpack.c.bf16 %v416_v57, %v847_v13 }
 0x10c   : > { %v748_v50 = vunpack.i.h.bf16 %v746_v46  ;;  %v747_v51 = vunpack.i.l.bf16 %v746_v46  ;;  %v758_v0 = vunpack.i.h.bf16 %v756_v45  ;;  %v757_v1 = vunpack.i.l.bf16 %v756_v45 }
 0x10d   : > { %681 = vmatprep.subr.msk.bf16.mxu0 %vm679_vm10, %v680_v47  ;;  %vm422_vm10 = vmand %vm324_vm3, %vm862_vm4 }
 0x10e   : > { %v398_v55 = vsel %vm397_vm11, %v392_v20, %v747_v51  ;;  %v399_v56 = vsel %vm397_vm11, %v747_v51, %v748_v50  ;;  %684 = vmatpush1.bf16.msk.msra.mxu0 %vm682_vm12, %v683_v48  ;;  %vm469_vm12 = vcmask 908288   ;;  %v435_v9 = vsel %vm433_vm6, %v757_v1, %v758_v0  ;;  %vm697_vm14 = vmpackc.low %vm324_vm3, %vm422_vm10 }
 0x10f   : > { %v686_v58 = vpack.c.bf16 %v399_v56, %v382_v54  ;;  %v689_v59 = vpack.c.bf16 %v398_v55, %v381_v53  ;;  %v428_v60 = vpop.permute.xlu0 %427  ;;  %v409_v61 = vpop.permute.xlu1 %408  ;;  %vm700_vm4 = vmpackc.low %vm787_vm9, %vm858_vm1  ;;  %vm487_vm1 = vcmask 588800  }
 0x110   : > { %v415_v62 = vsel %vm414_vm7, %v409_v61, %v752_v42  ;;  %vm450_vm7 = vcmask 916480   ;;  %v434_v14 = vsel %vm433_vm6, %v428_v60, %v757_v1 }
 0x111   : > { %687 = vmatprep.subr.msk.bf16.mxu0 %vm685_vm15, %v686_v58  ;;  %v695_v2 = vpack.c.bf16 %v415_v62, %v845_v12  ;;  %vm458_vm15 = vmand %vm324_vm3, %vm885_vm13 }
 0x112   : > { %690 = vmatpush1.bf16.msk.msra.mxu0 %vm688_vm0, %v689_v59  ;;  %vm491_vm0 = vcmask 1043456  }
 0x113   : > { %v766_v3 = vpop.permute.xlu0 %765  ;;  %v761_v4 = vpop.permute.xlu1 %760  ;;  %693 = vmatprep.subr.msk.bf16.mxu0 %vm691_vm2, %v692_v63 }
 0x114   : > { %v768_v5 = vunpack.i.h.bf16 %v766_v3  ;;  %v767_v6 = vunpack.i.l.bf16 %v766_v3  ;;  %v763_v7 = vunpack.i.h.bf16 %v761_v4  ;;  %v762_v8 = vunpack.i.l.bf16 %v761_v4 }
 0x116   : > { %696 = vmatpush1.bf16.msk.msra.mxu0 %vm694_vm5, %v695_v2  ;;  %v452_v10 = vsel %vm450_vm7, %v762_v8, %v763_v7  ;;  %v470_v11 = vsel %vm469_vm12, %v767_v6, %v768_v5 }
 0x117   : > { %v445_v12 = vpop.permute.xlu1 %444  ;;  %v698_v13 = vpack.c.bf16 %v452_v10, %v435_v9  ;;  %v474_v17 = vsel %vm873_vm8, %v470_v11, 0.0 }
 0x118   : > { %v451_v15 = vsel %vm450_vm7, %v445_v12, %v762_v8  ;;  %v484_v20 = vpack.c.bf16 %v474_v17, %v474_v17 }
 0x119   : > { %v701_v16 = vpack.c.bf16 %v451_v15, %v434_v14  ;;  %699 = vmatprep.subr.msk.bf16.mxu0 %vm697_vm14, %v698_v13 }
 0x11a   : > { %v493_v24 = vsel %vm491_vm0, %v484_v20, 0 }
 0x11b   : > { %v468_v18 = vpop.permute.xlu1 %467  ;;  %702 = vmatpush1.bf16.msk.msra.mxu0 %vm700_vm4, %v701_v16 }
 0x11c   : > { %v471_v19 = vsel %vm469_vm12, %v768_v5, %v468_v18 }
 0x11d   : > { %v475_v21 = vsel %vm458_vm15, %v471_v19, 0.0 }
 0x11e   : > { %v485_v23 = vpack.c.bf16 %v475_v21, %v475_v21 }
 0x120   : > { %703 = vmatprep.subr.msk.bf16.mxu0 %vm491_vm0, %v485_v23 }
 0x121   : > { %507 = vmatpush1.bf16.msra.mxu0 %v493_v24 }
 0x124   : > { %704 = vmatmul.mubr.msk.bf16.vlgmr.msra.gmra.mrb[0].mxu0 %vm487_vm1, %v486_v25 }
 0x1f7   : > { %v532_v22 = vpop.f32.mrb[0].mxu0 }
 0x1f8   : > { %539 = vst [vmem:[%s264_s19] sm:$0xff] %v532_v22  ;;  %v534_v26 = vpop.f32.mrb[1].mxu0  ;;  %v545_v27 = vmul.f32 %v532_v22, %v532_v22 }
 0x1f9   : > { %540 = vst [vmem:[%s264_s19 + $0x8] sm:$0xff] %v534_v26  ;;  %v536_v28 = vpop.f32.mrb[2].mxu0  ;;  %v541_v29 = vadd.f32 %v534_v26, %v532_v22  ;;  %v546_v30 = vmul.f32 %v534_v26, %v534_v26 }
 0x1fa   : > { %v537_v31 = vpop.f32.mrb[3].mxu0 }
 0x1fb   : > { %542 = vadd.xlane.f32.xlu0 %v541_v29  ;;  %v547_v32 = vadd.f32 %v546_v30, %v545_v27 }
 0x1fd   : > { %548 = vadd.xlane.f32.xlu1 %v547_v32 }
 0x288   : > { %v543_v33 = vpop.xlane.xlu0 %542 }
 0x289   : > { %544 = vst.msk [vmem:[%s268_s25] sm:$0xff] %vm397_vm11, %v543_v33 }
 0x28a   : > { %v549_v34 = vpop.xlane.xlu1 %548 }
 0x28b   : > { %550 = vst.msk [vmem:[%s272_s28] sm:$0xff] %vm397_vm11, %v549_v34 }
 0x28c PF: > { %s17_s21 = sadd.s32 1, %s775_s21  }
 0x28d   : > { %p14_p4 = scmp.ge.s32.totalorder %s17_s21, 4  }
 0x28f   :  { %16 = sbr.rel (!%p14_p4) target bundleno = 1 (0x1), region = 90 }

// kernel: resblock_forward.6
= control target key start
LH: loop header
LB: loop body
LE: loop exit
PB: predicated region body
PF: predicated region fallthrough
CT: control target
= control target key end

     0   :  { %s584_s21 = smov 0   ;;  %s621_s0 = inlined_call_operand.vmem [shape: f32[2,8,256], index: 0, kind: input, shape index: {}]   ;;  %s622_s1 = inlined_call_operand.vmem [shape: f32[8,1], index: 1, kind: input, shape index: {}]   ;;  %s623_s2 = inlined_call_operand.vmem [shape: f32[8,1], index: 2, kind: input, shape index: {}]   ;;  %s624_s3 = inlined_call_operand.vmem [shape: bf16[16,8], index: 3, kind: input, shape index: {}]   ;;  %s625_s4 = inlined_call_operand.vmem [shape: f32[2,16,256], index: 4, kind: output, shape index: {0}]   ;;  %s626_s5 = inlined_call_operand.vmem [shape: f32[2,16,1], index: 5, kind: output, shape index: {1}]   ;;  %s627_s6 = inlined_call_operand.vmem [shape: f32[2,16,1], index: 6, kind: output, shape index: {2}]  }
   0x1 LB: > { %s507_s22 = sadd.s32 4294967295, %s546_s21   ;;  %p511_p0 = scmp.ge.s32.totalorder %s546_s21, 1  ;;  %s546_s21 = sphi %s584_s21, %s17_s21  }
   0x2   : > { %p217_p1 = scmp.lt.s32.totalorder %s546_s21, 3 }
   0x4   : > { %p218_p2 = pnand %p511_p0, %p217_p1 }
   0x5   : > { %v280_v0 = vld [vmem:[%s622_s1] sm:$0xff] (!%p218_p2)  ;;  %v548_v1 = vmov (!%p218_p2), 0   ;;  %p257_p3 = scmp.lt.s32.totalorder (!%p218_p2), %s507_s22, 1  ;;  %vm311_vm0 = vcmask (!%p218_p2), 1043456   ;;  %vm307_vm1 = vcmask (!%p218_p2), 64512   ;;  %vm371_vm2 = vcmask (!%p218_p2), 7168  }
   0x6   : > { %221 = sbr.rel (%p218_p2) target bundleno = 515 (0x203), region = 36  ;;  %538 = vset.pattern.permute.xlu0 (!%p218_p2), %v548_v1  ;;  %350 = vmatprep.mubr.bf16.mxu0 (!%p218_p2), %v548_v1  ;;  %v288_v2 = vld [vmem:[%s623_s2] sm:$0xff] (!%p218_p2) }
   0x7   : > { %283 = vperm.xlu0 (!%p218_p2), %538, %v280_v0   ;;  %v539_v16 = vld [vmem:[%s624_s3] sm:$0xff] (!%p218_p2)  }
   0xb   : > { %291 = vperm.xlu0 (!%p218_p2), %538, %v288_v2  }
   0xd   : > { %s629_s22 = smov (!%p257_p3, %s507_s22), 1 }
   0xe   : > { %s598_s27 = sshll.u32 %s629_s22, 4  ;;  %s526_s9 = sshll.u32 %s629_s22, 5 }
   0xf   : > { %s261_s30 = scalar_lea.vmem %s621_s0, %s598_s27  ;;  %s266_s12 = scalar_lea.vmem %s625_s4, %s526_s9 }
  0x10   : > { %v278_v4 = vld [vmem:[%s261_s30] sm:$0xff]  ;;  %v279_v5 = vld [vmem:[%s261_s30 + $0x8] sm:$0xff]  ;;  %s271_s15 = scalar_lea.vmem %s626_s5, %s598_s27  ;;  %s276_s18 = scalar_lea.vmem %s627_s6, %s598_s27 }
  0x86   : > { %v284_v3 = vpop.permute.xlu0 %283 }
  0x87   : > { %v286_v6 = vmul.f32 %v284_v3, %v278_v4  ;;  %v287_v7 = vmul.f32 %v284_v3, %v279_v5 }
  0x8a   : > { %v292_v8 = vpop.permute.xlu0 %291 }
  0x8b   : > { %v294_v9 = vadd.f32 %v292_v8, %v286_v6  ;;  %v295_v10 = vadd.f32 %v292_v8, %v287_v7 }
  0x8d   : > { %v296_v11 = vmax.f32 %v294_v9, 0.0  ;;  %v297_v12 = vmax.f32 %v295_v10, 0.0 }
  0x8f   : > { %v301_v13 = vpack.c.bf16 %v297_v12, %v297_v12  ;;  %v300_v14 = vpack.c.bf16 %v296_v11, %v296_v11 }
  0x91   : > { %521 = vmatprep.subr.msk.bf16.mxu0 %vm311_vm0, %v301_v13  ;;  %v313_v15 = vsel %vm311_vm0, %v300_v14, 0 }
  0x92   : > { %319 = vmatpush1.bf16.msra.mxu0 %v313_v15 }
  0x95   : > { %522 = vmatmul.mubr.msk.bf16.vlgmr.msra.gmra.mrb[0].mxu0 %vm307_vm1, %v539_v16 }
 0x168   : > { %v352_v17 = vpop.f32.mrb[0].mxu0 }
 0x169   : > { %361 = vst [vmem:[%s266_s12] sm:$0xff] %v352_v17  ;;  %v354_v18 = vpop.f32.mrb[1].mxu0  ;;  %v374_v19 = vmul.f32 %v352_v17, %v352_v17 }
 0x16a   : > { %362 = vst [vmem:[%s266_s12 + $0x8] sm:$0xff] %v354_v18  ;;  %v356_v20 = vpop.f32.mrb[2].mxu0  ;;  %v365_v21 = vadd.f32 %v354_v18, %v352_v17  ;;  %v375_v22 = vmul.f32 %v354_v18, %v354_v18 }
 0x16b   : > { %363 = vst [vmem:[%s266_s12 + $0x10] sm:$0xff] %v356_v20  ;;  %v358_v23 = vpop.f32.mrb[3].mxu0  ;;  %v376_v24 = vmul.f32 %v356_v20, %v356_v20 }
 0x16c   : > { %364 = vst [vmem:[%s266_s12 + $0x18] sm:$0xff] %v358_v23  ;;  %v377_v25 = vmul.f32 %v358_v23, %v358_v23  ;;  %366 = vadd.xlane.f32.xlu1 %v365_v21  ;;  %v378_v26 = vadd.f32 %v375_v22, %v374_v19  ;;  %v368_v27 = vadd.f32 %v358_v23, %v356_v20 }
 0x16e   : > { %379 = vadd.xlane.f32.xlu0 %v378_v26  ;;  %v381_v28 = vadd.f32 %v377_v25, %v376_v24 }
 0x170   : > { %369 = vadd.xlane.f32.xlu1 %v368_v27 }
 0x174   : > { %382 = vadd.xlane.f32.xlu1 %v381_v28 }
 0x1f9   : > { %v367_v29 = vpop.xlane.xlu1 %366 }
 0x1fa   : > { %372 = vst.msk [vmem:[%s271_s15] sm:$0xff] %vm371_vm2, %v367_v29 }
 0x1fb   : > { %v380_v30 = vpop.xlane.xlu0 %379 }
 0x1fc   : > { %384 = vst.msk [vmem:[%s276_s18] sm:$0xff] %vm371_vm2, %v380_v30 }
 0x1fd   : > { %v370_v31 = vpop.xlane.xlu1 %369 }
 0x1fe   : > { %373 = vst.msk [vmem:[%s271_s15 + $0x8] sm:$0xff] %vm371_vm2, %v370_v31 }
 0x201   : > { %v383_v32 = vpop.xlane.xlu1 %382 }
 0x202   : > { %385 = vst.msk [vmem:[%s276_s18 + $0x8] sm:$0xff] %vm371_vm2, %v383_v32 }
 0x203 PF: > { %s17_s21 = sadd.s32 1, %s546_s21  }
 0x204   : > { %p14_p4 = scmp.ge.s32.totalorder %s17_s21, 4  }
 0x206   :  { %16 = sbr.rel (!%p14_p4) target bundleno = 1 (0x1), region = 90 }

// kernel: resblock_forward.7
= control target key start
LH: loop header
LB: loop body
LE: loop exit
PB: predicated region body
PF: predicated region fallthrough
CT: control target
= control target key end

     0   :  { %s398_s15 = smov 0   ;;  %s430_s0 = inlined_call_operand.vmem [shape: f32[2,16,256], index: 0, kind: input, shape index: {}]   ;;  %s431_s1 = inlined_call_operand.vmem [shape: f32[2,16,256], index: 1, kind: input, shape index: {}]   ;;  %s432_s2 = inlined_call_operand.vmem [shape: f32[16,1], index: 2, kind: input, shape index: {}]   ;;  %s433_s3 = inlined_call_operand.vmem [shape: f32[16,1], index: 3, kind: input, shape index: {}]   ;;  %s434_s4 = inlined_call_operand.vmem [shape: f32[2,16,256], index: 4, kind: output, shape index: {}]  }
   0x1 LB: > { %s337_s16 = sadd.s32 4294967295, %s370_s15   ;;  %p341_p0 = scmp.ge.s32.totalorder %s370_s15, 1  ;;  %s370_s15 = sphi %s398_s15, %s14_s15  }
   0x2   : > { %p172_p1 = scmp.lt.s32.totalorder %s370_s15, 3 }
   0x4   : > { %p173_p2 = pnand %p341_p0, %p172_p1 }
   0x5   : > { %v238_v0 = vld [vmem:[%s433_s3] sm:$0xff] (!%p173_p2)  ;;  %v372_v2 = vmov (!%p173_p2), 0   ;;  %v239_v3 = vld [vmem:[%s433_s3 + $0x8] sm:$0xff] (!%p173_p2)  ;;  %p203_p3 = scmp.lt.s32.totalorder (!%p173_p2), %s337_s16, 1 }
   0x6   : > { %176 = sbr.rel (%p173_p2) target bundleno = 148 (0x94), region = 36  ;;  %v222_v1 = vld [vmem:[%s432_s2] sm:$0xff] (!%p173_p2)  ;;  %363 = vset.pattern.permute.xlu1 (!%p173_p2), %v372_v2  ;;  %362 = vset.pattern.permute.xlu0 (!%p173_p2), %v372_v2  ;;  %v223_v4 = vld [vmem:[%s432_s2 + $0x8] sm:$0xff] (!%p173_p2) }
   0x7   : > { %242 = vperm.xlu1 (!%p173_p2), %363, %v238_v0   ;;  %226 = vperm.xlu0 (!%p173_p2), %362, %v222_v1  }
   0xb   : > { %247 = vperm.xlu1 (!%p173_p2), %363, %v239_v3   ;;  %231 = vperm.xlu0 (!%p173_p2), %362, %v223_v4  }
   0xd   : > { %s436_s16 = smov (!%p203_p3, %s337_s16), 1 }
   0xe   : > { %s350_s25 = sshll.u32 %s436_s16, 5 }
   0xf   : > { %s207_s28 = scalar_lea.vmem %s430_s0, %s350_s25  ;;  %s212_s5 = scalar_lea.vmem %s431_s1, %s350_s25 }
  0x10   : > { %v218_v5 = vld [vmem:[%s207_s28] sm:$0xff]  ;;  %v219_v6 = vld [vmem:[%s207_s28 + $0x8] sm:$0xff]  ;;  %v220_v13 = vld [vmem:[%s207_s28 + $0x10] sm:$0xff]  ;;  %s217_s8 = scalar_lea.vmem %s434_s4, %s350_s25 }
  0x11   : > { %v254_v11 = vld [vmem:[%s212_s5] sm:$0xff]  ;;  %v255_v12 = vld [vmem:[%s212_s5 + $0x8] sm:$0xff]  ;;  %v221_v14 = vld [vmem:[%s207_s28 + $0x18] sm:$0xff] }
  0x12   : > { %v256_v23 = vld [vmem:[%s212_s5 + $0x10] sm:$0xff]  ;;  %v257_v24 = vld [vmem:[%s212_s5 + $0x18] sm:$0xff] }
  0x86   : > { %v243_v7 = vpop.permute.xlu1 %242  ;;  %v227_v8 = vpop.permute.xlu0 %226 }
  0x87   : > { %v234_v9 = vmul.f32 %v227_v8, %v218_v5  ;;  %v235_v10 = vmul.f32 %v227_v8, %v219_v6 }
  0x89   : > { %v250_v15 = vadd.f32 %v243_v7, %v234_v9  ;;  %v251_v16 = vadd.f32 %v243_v7, %v235_v10 }
  0x8a   : > { %v232_v17 = vpop.permute.xlu0 %231  ;;  %v248_v22 = vpop.permute.xlu1 %247 }
  0x8b   : > { %v258_v18 = vadd.f32 %v254_v11, %v250_v15  ;;  %v259_v19 = vadd.f32 %v255_v12, %v251_v16  ;;  %v236_v20 = vmul.f32 %v232_v17, %v220_v13  ;;  %v237_v21 = vmul.f32 %v232_v17, %v221_v14 }
  0x8d   : > { %v262_v25 = vmax.f32 %v258_v18, 0.0  ;;  %v263_v26 = vmax.f32 %v259_v19, 0.0  ;;  %v252_v27 = vadd.f32 %v248_v22, %v236_v20  ;;  %v253_v28 = vadd.f32 %v248_v22, %v237_v21 }
  0x8f   : > { %266 = vst [vmem:[%s217_s8] sm:$0xff] %v262_v25  ;;  %267 = vst [vmem:[%s217_s8 + $0x8] sm:$0xff] %v263_v26  ;;  %v260_v29 = vadd.f32 %v256_v23, %v252_v27  ;;  %v261_v30 = vadd.f32 %v257_v24, %v253_v28 }
  0x91   : > { %v264_v31 = vmax.f32 %v260_v29, 0.0  ;;  %v265_v32 = vmax.f32 %v261_v30, 0.0 }
  0x93   : > { %268 = vst [vmem:[%s217_s8 + $0x10] sm:$0xff] %v264_v31  ;;  %269 = vst [vmem:[%s217_s8 + $0x18] sm:$0xff] %v265_v32 }
  0x94 PF: > { %s14_s15 = sadd.s32 1, %s370_s15  }
  0x95   : > { %p11_p4 = scmp.ge.s32.totalorder %s14_s15, 4  }
  0x97   :  { %13 = sbr.rel (!%p11_p4) target bundleno = 1 (0x1), region = 69 }

</bundles_post_ra>
